<compile_context>
chip_gen: v7x
topology: tpu7x:2x2x1
jax: 0.10.0
libtpu: 0.0.40
codegen_flags: <defaults>
</compile_context>

<pallas_src>
import jax
import jax.numpy as jnp
from jax.experimental import pallas as pl
from jax.experimental.pallas import tpu as pltpu

# ----------------------------- model sizes ---------------------------------
VOCAB_SIZE = 100
EMBED_DIM = 32
NUM_CLASSES = 4
BATCH = 8            # micro-batch rows per grid step
SEQ = 8
N_STACK = 4          # number of micro-batches handled by one pallas_call (grid axis)
BN_EPS = 1e-5
HIDDEN = (128, 64, 32)

VOCAB_PAD = 128      # vocab padded to one lane tile; also the K dim of fused layer 1
FEAT_PAD = 128       # every hidden / output feature dim padded to 128 lanes

# Packed-weight row offsets: multiples of 128 -> tile-aligned static slices.
_W_OFFS = (0, 128, 256, 384)
_W_ROWS = 512


# ------------------------------ Pallas kernel -------------------------------
def _classifier_kernel(ids_ref, w_ref, b_ref, out_ref):
    B, S = ids_ref.shape
    ids = ids_ref[...]                                               # (B, S) int32

    # Token-count one-hot in bf16 (exact: counts <= SEQ = 8).
    vocab_iota = jax.lax.broadcasted_iota(jnp.int32, (1, 1, VOCAB_PAD), 2)
    onehot = (ids[:, :, None] == vocab_iota).astype(jnp.bfloat16)    # (B, S, VPAD)
    counts = jnp.sum(onehot, axis=1)                                 # (B, VPAD) bf16

    # Layer 1: counts @ (emb/SEQ @ W1_bnfolded) + b1 -> ReLU  (Dropout = identity, eval)
    h = jnp.dot(counts, w_ref[_W_OFFS[0]:_W_OFFS[0] + 128, :],
                preferred_element_type=jnp.float32) + b_ref[0:1, :]
    h = jnp.maximum(h, 0.0)
    # Layer 2 (BN folded)
    h = jnp.dot(h.astype(jnp.bfloat16), w_ref[_W_OFFS[1]:_W_OFFS[1] + 128, :],
                preferred_element_type=jnp.float32) + b_ref[1:2, :]
    h = jnp.maximum(h, 0.0)
    # Layer 3 (BN folded)
    h = jnp.dot(h.astype(jnp.bfloat16), w_ref[_W_OFFS[2]:_W_OFFS[2] + 128, :],
                preferred_element_type=jnp.float32) + b_ref[2:3, :]
    h = jnp.maximum(h, 0.0)
    # Output layer (real classes live in lanes [0, NUM_CLASSES); rest are zero pad)
    out = jnp.dot(h.astype(jnp.bfloat16), w_ref[_W_OFFS[3]:_W_OFFS[3] + 128, :],
                  preferred_element_type=jnp.float32) + b_ref[3:4, :]
    out_ref[...] = out                                               # lane-dense (B, 128)


def text_classifier_forward(x_ids_stacked, w_packed, b_packed):
    """x_ids_stacked: (N, B, S) int32 token ids (assumed < VOCAB_SIZE).
    Returns (N, B, FEAT_PAD) float32 padded logits (classes in lanes [0, NUM_CLASSES))."""
    # TODO(synk): PyTorch nn.Embedding raises on out-of-range ids; here ids >= VOCAB_PAD
    # silently contribute zero — add a clamp/assert at the call site if inputs are untrusted.
    N, B, S = x_ids_stacked.shape
    return pl.pallas_call(
        _classifier_kernel,
        out_shape=jax.ShapeDtypeStruct((N, B, FEAT_PAD), jnp.float32),
        grid=(N,),
        in_specs=[
            pl.BlockSpec((None, B, S), lambda n: (n, 0, 0)),          # ids: one micro-batch
            pl.BlockSpec((_W_ROWS, FEAT_PAD), lambda n: (0, 0)),      # weights: resident
            pl.BlockSpec((4, FEAT_PAD), lambda n: (0, 0)),            # biases: resident
        ],
        out_specs=pl.BlockSpec((None, B, FEAT_PAD), lambda n: (n, 0, 0)),
        compiler_params=pltpu.CompilerParams(dimension_semantics=("parallel",)),
    )(x_ids_stacked, w_packed, b_packed)


# --------------------------- parameter construction -------------------------
def _linear_init(key, fan_in, fan_out):
    """PyTorch nn.Linear default init: U(-1/sqrt(fan_in), 1/sqrt(fan_in))."""
    kw, kb = jax.random.split(key)
    bound = 1.0 / jnp.sqrt(fan_in)
    w = jax.random.uniform(kw, (fan_in, fan_out), jnp.float32, -bound, bound)
    b = jax.random.uniform(kb, (1, fan_out), jnp.float32, -bound, bound)
    return w, b


def _bn_default(dim):
    """PyTorch BatchNorm1d defaults: gamma=1, beta=0, running_mean=0, running_var=1."""
    gamma = jnp.ones((1, dim), jnp.float32)
    beta = jnp.zeros((1, dim), jnp.float32)
    mean = jnp.zeros((1, dim), jnp.float32)
    var = jnp.ones((1, dim), jnp.float32)
    return gamma, beta, mean, var


def _fold_bn(w, b, bn):
    """Fold eval-mode BN into the preceding Linear: W' = W*scale, b' = b*scale+shift."""
    gamma, beta, mean, var = bn
    scale = gamma / jnp.sqrt(var + BN_EPS)
    shift = beta - mean * scale
    return w * scale, b * scale + shift


def _pad_to(a, rows, cols):
    return jnp.pad(a, ((0, rows - a.shape[0]), (0, cols - a.shape[1])))


def make_params(key):
    k_emb, k1, k2, k3, k4 = jax.random.split(key, 5)
    # nn.Embedding default init: N(0, 1)
    emb_table = jax.random.normal(k_emb, (VOCAB_SIZE, EMBED_DIM), jnp.float32)

    fan_ins = (EMBED_DIM, HIDDEN[0], HIDDEN[1], HIDDEN[2])
    fan_outs = (HIDDEN[0], HIDDEN[1], HIDDEN[2], NUM_CLASSES)
    lin = [_linear_init(k, fi, fo) for k, fi, fo in zip((k1, k2, k3, k4), fan_ins, fan_outs)]
    bns = [_bn_default(d) for d in HIDDEN]

    ref_params = (emb_table, lin, bns)

    # ---- fold BN into linears ----
    w1f, b1f = _fold_bn(lin[0][0], lin[0][1], bns[0])
    w2f, b2f = _fold_bn(lin[1][0], lin[1][1], bns[1])
    w3f, b3f = _fold_bn(lin[2][0], lin[2][1], bns[2])
    w4f, b4f = lin[3]

    # ---- fold embedding table + 1/SEQ mean into layer 1 ----
    # mean_emb @ W1' = (counts/SEQ) @ emb @ W1' = counts @ ((emb/SEQ) @ W1')
    emb_pad = _pad_to(emb_table, VOCAB_PAD, EMBED_DIM) / float(SEQ)   # (128, 32)
    emb_w1 = emb_pad @ w1f                                            # (128, 128) f32

    w_packed = jnp.concatenate([
        _pad_to(emb_w1, FEAT_PAD, FEAT_PAD),     # rows   0..127  fused emb+W1 (+BN1, /SEQ)
        _pad_to(w2f, FEAT_PAD, FEAT_PAD),        # rows 128..255  cols 64..127 zero
        _pad_to(w3f, FEAT_PAD, FEAT_PAD),        # rows 256..383  rows 64.., cols 32.. zero
        _pad_to(w4f, FEAT_PAD, FEAT_PAD),        # rows 384..511  rows 32.., cols  4.. zero
    ], axis=0).astype(jnp.bfloat16)              # (512, 128) bf16
    assert w_packed.shape == (_W_ROWS, FEAT_PAD)

    b_packed = jnp.concatenate([
        _pad_to(b1f, 1, FEAT_PAD),
        _pad_to(b2f, 1, FEAT_PAD),
        _pad_to(b3f, 1, FEAT_PAD),
        _pad_to(b4f, 1, FEAT_PAD),
    ], axis=0)                                   # (4, 128) f32

    return ref_params, (w_packed, b_packed)


# ------------------------------ pure-JAX reference ---------------------------
def reference_forward(x_ids, ref_params):
    """x_ids: (B, S) int32 -> (B, NUM_CLASSES) f32, eval-mode semantics."""
    emb_table, lin, bns = ref_params
    h = jnp.take(emb_table, x_ids, axis=0).mean(axis=1)
    for (w, b), (gamma, beta, mean, var) in zip(lin[:3], bns):
        h = h @ w + b
        h = (h - mean) / jnp.sqrt(var + BN_EPS) * gamma + beta
        h = jnp.maximum(h, 0.0)
    w4, b4 = lin[3]
    return h @ w4 + b4


# ----------------------------------- main ------------------------------------
if __name__ == "__main__":
    key = jax.random.PRNGKey(0)
    k_params, k_ids = jax.random.split(key)

    ref_params, (w_packed, b_packed) = make_params(k_params)

    # token ids: (N_STACK, BATCH, SEQ) int32, all < VOCAB_SIZE
    x_ids = jax.random.randint(k_ids, (N_STACK, BATCH, SEQ), 0, VOCAB_SIZE, dtype=jnp.int32)

    out_padded = text_classifier_forward(x_ids, w_packed, b_packed)
    out_padded = jax.block_until_ready(out_padded)
    assert out_padded.shape == (N_STACK, BATCH, FEAT_PAD)

    # consumer-side slice of the real classes (kept out of the kernel wrapper on purpose)
    logits = out_padded[..., :NUM_CLASSES]

    ref = reference_forward(x_ids.reshape(N_STACK * BATCH, SEQ), ref_params)
    ref = ref.reshape(N_STACK, BATCH, NUM_CLASSES)

    # bf16 matmul operands -> loosened tolerance vs the f32 reference
    assert jnp.allclose(logits, ref, atol=5e-2, rtol=5e-2), "mismatch vs JAX reference"

    print("KERNEL_OK")
</pallas_src>

<mosaic_0001>
module attributes {stable_mosaic.version = 11 : i64} {
  func.func @_classifier_kernel(%arg0: i32, %arg1: memref<1x8x8xi32, #tpu.memory_space<vmem>>, %arg2: memref<512x128xbf16, #tpu.memory_space<vmem>>, %arg3: memref<4x128xf32, #tpu.memory_space<vmem>>, %arg4: memref<1x8x128xf32, #tpu.memory_space<vmem>>) attributes {dimension_semantics = [#tpu.dimension_semantics<parallel>], iteration_bounds = array<i64: 4>, scalar_prefetch = 0 : i64, scratch_operands = 0 : i64, tpu.core_type = #tpu.core_type<tc>, window_params = [{transform_indices = @transform_0, window_bounds = array<i64: 1, 8, 8>}, {pipeline_mode = #tpu.pipeline_mode<synchronous>, transform_indices = @transform_1, window_bounds = array<i64: 512, 128>}, {pipeline_mode = #tpu.pipeline_mode<synchronous>, transform_indices = @transform_2, window_bounds = array<i64: 4, 128>}, {transform_indices = @transform_3, window_bounds = array<i64: 1, 8, 128>}]} {
    %c0 = arith.constant 0 : index
    %c0_0 = arith.constant 0 : index
    %c0_1 = arith.constant 0 : index
    %0 = vector.load %arg1[%c0, %c0_0, %c0_1] : memref<1x8x8xi32, #tpu.memory_space<vmem>>, vector<1x8x8xi32>
    %1 = vector.shape_cast %0 : vector<1x8x8xi32> to vector<8x8xi32>
    %2 = tpu.iota {dimensions = array<i32: 2>} : vector<1x1x128xi32>
    %3 = vector.shape_cast %1 : vector<8x8xi32> to vector<8x8x1xi32>
    %4 = vector.broadcast %3 : vector<8x8x1xi32> to vector<8x8x128xi32>
    %5 = vector.broadcast %2 : vector<1x1x128xi32> to vector<8x8x128xi32>
    %6 = arith.cmpi eq, %4, %5 : vector<8x8x128xi32>
    %7 = arith.extui %6 : vector<8x8x128xi1> to vector<8x8x128xi32>
    %8 = arith.sitofp %7 : vector<8x8x128xi32> to vector<8x8x128xf32>
    %9 = arith.truncf %8 : vector<8x8x128xf32> to vector<8x8x128xbf16>
    %10 = arith.extf %9 : vector<8x8x128xbf16> to vector<8x8x128xf32>
    %cst = arith.constant dense<0.000000e+00> : vector<8x128xf32>
    %11 = vector.multi_reduction <add>, %10, %cst [1] : vector<8x8x128xf32> to vector<8x128xf32>
    %12 = arith.truncf %11 : vector<8x128xf32> to vector<8x128xbf16>
    %c0_2 = arith.constant 0 : index
    %c0_3 = arith.constant 0 : index
    %13 = vector.load %arg2[%c0_2, %c0_3] : memref<512x128xbf16, #tpu.memory_space<vmem>>, vector<128x128xbf16>
    %cst_4 = arith.constant dense<0.000000e+00> : vector<8x128xf32>
    %14 = tpu.matmul %12, %13, %cst_4 {dimension_numbers = #tpu.dot_dimension_numbers<[1], [0], [0], [1], [0, 0, 1, 1], [], []>} : vector<8x128xbf16>, vector<128x128xbf16>, vector<8x128xf32> -> vector<8x128xf32>
    %c0_5 = arith.constant 0 : index
    %c0_6 = arith.constant 0 : index
    %15 = vector.load %arg3[%c0_5, %c0_6] : memref<4x128xf32, #tpu.memory_space<vmem>>, vector<1x128xf32>
    %16 = vector.broadcast %15 : vector<1x128xf32> to vector<8x128xf32>
    %17 = arith.addf %14, %16 : vector<8x128xf32>
    %cst_7 = arith.constant 0.000000e+00 : f32
    %18 = vector.broadcast %cst_7 : f32 to vector<8x128xf32>
    %19 = arith.maximumf %17, %18 : vector<8x128xf32>
    %20 = arith.truncf %19 : vector<8x128xf32> to vector<8x128xbf16>
    %c128 = arith.constant 128 : index
    %c0_8 = arith.constant 0 : index
    %21 = vector.load %arg2[%c128, %c0_8] : memref<512x128xbf16, #tpu.memory_space<vmem>>, vector<128x128xbf16>
    %cst_9 = arith.constant dense<0.000000e+00> : vector<8x128xf32>
    %22 = tpu.matmul %20, %21, %cst_9 {dimension_numbers = #tpu.dot_dimension_numbers<[1], [0], [0], [1], [0, 0, 1, 1], [], []>} : vector<8x128xbf16>, vector<128x128xbf16>, vector<8x128xf32> -> vector<8x128xf32>
    %c1 = arith.constant 1 : index
    %c0_10 = arith.constant 0 : index
    %23 = vector.load %arg3[%c1, %c0_10] : memref<4x128xf32, #tpu.memory_space<vmem>>, vector<1x128xf32>
    %24 = vector.broadcast %23 : vector<1x128xf32> to vector<8x128xf32>
    %25 = arith.addf %22, %24 : vector<8x128xf32>
    %cst_11 = arith.constant 0.000000e+00 : f32
    %26 = vector.broadcast %cst_11 : f32 to vector<8x128xf32>
    %27 = arith.maximumf %25, %26 : vector<8x128xf32>
    %28 = arith.truncf %27 : vector<8x128xf32> to vector<8x128xbf16>
    %c256 = arith.constant 256 : index
    %c0_12 = arith.constant 0 : index
    %29 = vector.load %arg2[%c256, %c0_12] : memref<512x128xbf16, #tpu.memory_space<vmem>>, vector<128x128xbf16>
    %cst_13 = arith.constant dense<0.000000e+00> : vector<8x128xf32>
    %30 = tpu.matmul %28, %29, %cst_13 {dimension_numbers = #tpu.dot_dimension_numbers<[1], [0], [0], [1], [0, 0, 1, 1], [], []>} : vector<8x128xbf16>, vector<128x128xbf16>, vector<8x128xf32> -> vector<8x128xf32>
    %c2 = arith.constant 2 : index
    %c0_14 = arith.constant 0 : index
    %31 = vector.load %arg3[%c2, %c0_14] : memref<4x128xf32, #tpu.memory_space<vmem>>, vector<1x128xf32>
    %32 = vector.broadcast %31 : vector<1x128xf32> to vector<8x128xf32>
    %33 = arith.addf %30, %32 : vector<8x128xf32>
    %cst_15 = arith.constant 0.000000e+00 : f32
    %34 = vector.broadcast %cst_15 : f32 to vector<8x128xf32>
    %35 = arith.maximumf %33, %34 : vector<8x128xf32>
    %36 = arith.truncf %35 : vector<8x128xf32> to vector<8x128xbf16>
    %c384 = arith.constant 384 : index
    %c0_16 = arith.constant 0 : index
    %37 = vector.load %arg2[%c384, %c0_16] : memref<512x128xbf16, #tpu.memory_space<vmem>>, vector<128x128xbf16>
    %cst_17 = arith.constant dense<0.000000e+00> : vector<8x128xf32>
    %38 = tpu.matmul %36, %37, %cst_17 {dimension_numbers = #tpu.dot_dimension_numbers<[1], [0], [0], [1], [0, 0, 1, 1], [], []>} : vector<8x128xbf16>, vector<128x128xbf16>, vector<8x128xf32> -> vector<8x128xf32>
    %c3 = arith.constant 3 : index
    %c0_18 = arith.constant 0 : index
    %39 = vector.load %arg3[%c3, %c0_18] : memref<4x128xf32, #tpu.memory_space<vmem>>, vector<1x128xf32>
    %40 = vector.broadcast %39 : vector<1x128xf32> to vector<8x128xf32>
    %41 = arith.addf %38, %40 : vector<8x128xf32>
    %c0_19 = arith.constant 0 : index
    %c0_20 = arith.constant 0 : index
    %c0_21 = arith.constant 0 : index
    %42 = vector.load %arg4[%c0_19, %c0_20, %c0_21] : memref<1x8x128xf32, #tpu.memory_space<vmem>>, vector<1x8x128xf32>
    %43 = vector.shape_cast %42 : vector<1x8x128xf32> to vector<8x128xf32>
    %44 = vector.shape_cast %41 : vector<8x128xf32> to vector<1x8x128xf32>
    tpu.vector_store %arg4[%c0_19, %c0_20, %c0_21], %44 {strides = array<i32>} : memref<1x8x128xf32, #tpu.memory_space<vmem>>, vector<1x8x128xf32>,
    return
  }
  func.func @transform_0(%arg0: i32) -> (i32, i32, i32) {
    %c0_i32 = arith.constant 0 : i32
    %c0_i32_0 = arith.constant 0 : i32
    %c0_i32_1 = arith.constant 0 : i32
    return %arg0, %c0_i32, %c0_i32_0 : i32, i32, i32
  }
  func.func @transform_1(%arg0: i32) -> (i32, i32) {
    %c0_i32 = arith.constant 0 : i32
    %c0_i32_0 = arith.constant 0 : i32
    %c0_i32_1 = arith.constant 0 : i32
    return %c0_i32, %c0_i32_0 : i32, i32
  }
  func.func @transform_2(%arg0: i32) -> (i32, i32) {
    %c0_i32 = arith.constant 0 : i32
    %c0_i32_0 = arith.constant 0 : i32
    %c0_i32_1 = arith.constant 0 : i32
    return %c0_i32, %c0_i32_0 : i32, i32
  }
  func.func @transform_3(%arg0: i32) -> (i32, i32, i32) {
    %c0_i32 = arith.constant 0 : i32
    %c0_i32_0 = arith.constant 0 : i32
    %c0_i32_1 = arith.constant 0 : i32
    return %arg0, %c0_i32, %c0_i32_0 : i32, i32, i32
  }
}

</mosaic_0001>

<bundles_post_ra>
// kernel: tpu_custom_call.1
= control target key start
LH: loop header
LB: loop body
LE: loop exit
PB: predicated region body
PF: predicated region fallthrough
CT: control target
= control target key end

     0   :  { %8 = vsyncpa [#allocation3], 0  ;;  %s1603_s0 = inlined_call_operand.hbm [shape: s32[4,8,8], index: 0, kind: input, shape index: {}]   ;;  %s1604_s1 = inlined_call_operand.hbm [shape: bf16[512,128], index: 1, kind: input, shape index: {}]   ;;  %s1605_s2 = inlined_call_operand.vmem [shape: f32[4,128], index: 2, kind: input, shape index: {}]   ;;  %s1606_s3 = inlined_call_operand.hbm [shape: f32[4,8,128], index: 3, kind: output, shape index: {}]  }
   0x1   :  { %10 = vsyncpa [#allocation3 + $0x1], 0 }
   0x2   :  { %11 = vsyncpa [#allocation6], 0 }
   0x3   :  { %12 = vsyncpa [#allocation4], 0 }
   0x4   :  { %14 = vsyncpa [#allocation4 + $0x1], 0  ;;  %s1350_s12 = smov 0   ;;  %s1352_s13 = smov 0  }
   0x5   :  { %s1354_s14 = smov 0   ;;  %s1356_s15 = smov 0  }
   0x6 LB: > { %s1371_s16 = sadd.s32 4294967295, %s1321_s15   ;;  %s926_s17 = sadd.s32 4294967294, %s1321_s15   ;;  %s1321_s15 = sphi %s1356_s15, %s1625_s15   ;;  %s1317_s14 = sphi %s1354_s14, %s1624_s14   ;;  %s1313_s13 = sphi %s1352_s13, %s1623_s13   ;;  %s1309_s12 = sphi %s1350_s12, %s1622_s12  }
   0x7   : > { %p40_p0 = scmp.ne.s32.totalorder %s1313_s13, %s1309_s12  ;;  %p1607_p1 = scmp.eq.s32.totalorder %s1371_s16, 0 }
   0x8   : > { %p112_p3 = scmp.eq.s32.totalorder %s926_s17, 3  ;;  %p927_p5 = scmp.ge.s32.totalorder %s1321_s15, 1 }
   0x9   : > { %p1380_p4 = por %p1607_p1, %p40_p0  ;;  %p119_p7 = scmp.lt.s32.totalorder %s1321_s15, 5 }
   0xa   : > { %p1385_p6 = por %p112_p3, %p40_p0  ;;  %s1323_s21 = smov [#allocation5]  }
   0xb   : > { %s1610_s18 = scalar_select %p1380_p4, 1, 0 }
   0xc   : > { %s1611_s19 = scalar_select %p1385_p6, 1, 0 }
   0xd   : > { %p1390_p8 = pnand %p927_p5, %p119_p7  ;;  %s131_s22 = sshll.u32 %s1323_s21, 4  ;;  %s132_s22 = int_to_ptr.vmem [resolvable:$true] %s131_s22 }
   0xe   : > { %s1403_s24 = sadd.s32 1, %s1321_s15   ;;  %s27_s25 = sadd.s32 1, %s1317_s14 }
   0xf   : > { %s1612_s20 = scalar_select %p1390_p8, 1, 0 }
  0x10   : > { %p1108_p9 = pneg %p1390_p8  ;;  %s24_s26 = ssub.s32 %s1321_s15, %s1403_s24 }
  0x11   : > { %s1193_s29 = scalar_lea.hbm %s1604_s1, 4096 }
  0x12   : > { %p1398_p10 = pnand %p1108_p9, %p1607_p1  ;;  %p1194_p11 = scmp.ne.s32.totalorder %s1604_s1, %s1193_s29 }
  0x13   : > { %p1200_p3 = scmp.lt.u32.totalorder %s1193_s29, %s1604_s1 }
  0x14   : > { %p1195_p12 = pneg %p1398_p10 }
  0x16   : > { %p1196_p13 = pnand %p1195_p12, %p1194_p11 }
  0x18   : > { %p1197_p0 = pneg %p1196_p13 }
  0x1a   : > { %p1202_p5 = pnand %p1200_p3, %p1197_p0 }
  0x1c   : > { %1205 = shalt.err (!%p1202_p5)
}
  0x1d   : > { %s1206_s7 = scalar_lea.vmem %s132_s22, 4096  ;;  %p1214_p2 = scmp.lt.s32.totalorder %s132_s22, %s132_s22 }
  0x1e   : > { %p1207_p7 = scmp.ne.s32.totalorder %s132_s22, %s1206_s7  ;;  %p1215_p6 = scmp.lt.s32.totalorder %s1206_s7, %s1206_s7 }
  0x20   : > { %p1209_p9 = pnand %p1207_p7, %p1195_p12  ;;  %p1216_p4 = por %p1215_p6, %p1214_p2 }
  0x22   : > { %p1210_p1 = pneg %p1209_p9 }
  0x24   : > { %p1217_p8 = pnand %p1216_p4, %p1210_p1 }
  0x26   : > { %1220 = shalt.err (!%p1217_p8)
}
  0x27   : > { %s1324_s8 = smov 64   ;;  %s1325_s9 = smov 4  }
  0x28   : > { %1111 = dma.hbm_to_vmem [thread:$0]  (!%p1398_p10), %s1604_s1, 4096, %s132_s22, [#allocation6], %s1324_s8, %s1324_s8, %s1325_s9  }
  0x29   : > { %p25_p11 = scmp.eq.s32.totalorder %s24_s26, 0  ;;  %p34_p2 = scmp.ne.s32.totalorder %s1317_s14, %s1313_s13 }
  0x2a   : > { %p35_p1 = scmp.eq.s32.totalorder %s1321_s15, 0  ;;  %p1121_p4 = scmp.lt.s32.totalorder %s1321_s15, 4 }
  0x2b   : > { %s1429_s17 = scalar_select %p25_p11, %s1317_s14, %s27_s25  }
  0x2c   : > { %p36_p6 = por %p35_p1, %p34_p2  ;;  %p1614_p8 = scmp.eq.s32.totalorder %s1371_s16, 3 }
  0x2d   : > { %s148_s27 = sand.u32 1, %s1317_s14   ;;  %s931_s28 = sshll.u32 %s1321_s15, 7 }
  0x2e   : > { %p1433_p12 = por %p1614_p8, %p34_p2  ;;  %s930_s29 = sshll.u32 %s148_s27, 3 }
  0x2f   : > { %s1442_s4 = scalar_lea.hbm %s1603_s0, %s931_s28  ;;  %s152_s22 = scalar_lea.vmem [#allocation2], %s930_s29 }
  0x30   : > { %s159_s25 = sshll.u32 %s152_s22, 4  ;;  %p1444_p10 = pnand %p1121_p4, %p36_p6  ;;  %s1448_s25 = int_to_ptr.vmem [resolvable:$true] %s159_s25 }
  0x31   : > { %s149_s5 = scalar_lea.sflag [#allocation3], %s148_s27  ;;  %s1221_s6 = scalar_lea.hbm %s1442_s4, 128 }
  0x32   : > { %p1222_p13 = scmp.ne.s32.totalorder %s1442_s4, %s1221_s6  ;;  %p1223_p0 = pneg %p1444_p10 }
  0x33   : > { %s1226_s9 = scalar_lea.hbm %s1603_s0, 512  ;;  %p1227_p7 = scmp.lt.u32.totalorder %s1442_s4, %s1603_s0 }
  0x34   : > { %p1224_p3 = pnand %p1223_p0, %p1222_p13  ;;  %p1228_p9 = scmp.lt.u32.totalorder %s1226_s9, %s1221_s6 }
  0x35   : > { %p1230_p2 = scmp.lt.u32.totalorder %s1221_s6, %s1442_s4 }
  0x36   : > { %p1225_p5 = pneg %p1224_p3  ;;  %p1229_p11 = por %p1228_p9, %p1227_p7 }
  0x38   : > { %p1231_p1 = por %p1230_p2, %p1229_p11 }
  0x3a   : > { %p1232_p4 = pnand %p1231_p1, %p1225_p5 }
  0x3c   : > { %1235 = shalt.err (!%p1232_p4)
}
  0x3d   : > { %s1236_s27 = scalar_lea.vmem %s1448_s25, 128  ;;  %s1326_s28 = smov [#allocation2]  }
  0x3e   : > { %p1237_p6 = scmp.ne.s32.totalorder %s1448_s25, %s1236_s27  ;;  %s1241_s29 = sshll.u32 %s1326_s28, 4  ;;  %s1242_s29 = int_to_ptr.vmem [resolvable:$false] %s1241_s29 }
  0x3f   : > { %s1243_s23 = scalar_lea.vmem %s1242_s29, 256  ;;  %p1244_p3 = scmp.lt.s32.totalorder %s1448_s25, %s1242_s29 }
  0x40   : > { %p1239_p8 = pnand %p1237_p6, %p1223_p0  ;;  %p1245_p7 = scmp.lt.s32.totalorder %s1243_s23, %s1236_s27 }
  0x42   : > { %p1240_p13 = pneg %p1239_p8  ;;  %p1246_p9 = por %p1245_p7, %p1244_p3 }
  0x44   : > { %p1247_p11 = pnand %p1246_p9, %p1240_p13 }
  0x46   : > { %1250 = shalt.err (!%p1247_p11)
}
  0x47   : > { %1115 = dma.hbm_to_vmem [thread:$0]  (!%p1444_p10), %s1442_s4, 128, %s1448_s25, %s149_s5  }
  0x48   : > { %p1617_p5 = scmp.ne.s32.totalorder %s1612_s20, 0 }
  0x49   : > { %s1478_s30 = sand.u32 (!%p1617_p5), 1, %s1313_s13   ;;  %p1618_p0 = scmp.ne.s32.totalorder (!%p1617_p5), %s1610_s18, 0 }
  0x4a   : > { %168 = sbr.rel (%p1617_p5) target bundleno = 1126 (0x466), region = 32  ;;  %s933_s22 = sshll.u32 (!%p1617_p5), %s1478_s30, 3 }
  0x4b   : > { %s171_s6 = scalar_lea.sflag (!%p1617_p5), [#allocation3], %s1478_s30  ;;  %s174_s7 = scalar_lea.vmem (!%p1617_p5), [#allocation2], %s933_s22 }
  0x51   : > { %1296 = dma.done.wait (%p1618_p0), %s171_s6, 128  }
  0x52   : > { %1298 = vsyncadd (%p1618_p0), %s171_s6, 4294967168  ;;  %p1619_p10 = scmp.eq.s32.totalorder %s1371_s16, 0 }
  0x54   : > { %1300 = dma.done.wait (%p1619_p10), [#allocation6], 4096   ;;  %p1620_p2 = pmov %p1619_p10 }
  0x55   : > { %v203_v0 = vlaneseq  ;;  %v1327_v1 = vmov 0.0   ;;  %v202_v7 = vld [vmem:[%s174_s7] sm:$0xff]  ;;  %v1161_v10 = vld [vmem:[#allocation5] sm:$0xff]   ;;  %v1162_v16 = vld [vmem:[#allocation5 + $0x8] sm:$0xff]   ;;  %vm1328_vm0 = vmmov 0   ;;  %vm394_vm9 = vcmask 1041409  }
  0x56   : > { %1302 = vsyncadd (%p1620_p2), [#allocation6], 4294963200  ;;  %1020 = vmatprep.subr.bf16.mxu0 %v1327_v1  ;;  %1040 = vmatprep.subr.bf16.mxu1 %v1327_v1  ;;  %v1163_v20 = vld [vmem:[#allocation5 + $0x10] sm:$0xff]   ;;  %v1164_v23 = vld [vmem:[#allocation5 + $0x18] sm:$0xff]   ;;  %vm396_vm10 = vcmask 1042434   ;;  %vm398_vm11 = vcmask 1043459  }
  0x57   : > { %v206_v2 = vshrl.u32 %v203_v0, 7  ;;  %1021 = vmatpush3.bf16.msra.mxu0 %v1161_v10  ;;  %v1165_v24 = vld [vmem:[#allocation5 + $0x20] sm:$0xff]   ;;  %v1166_v25 = vld [vmem:[#allocation5 + $0x28] sm:$0xff]   ;;  %1036 = vmatprep.mubr.msk.bf16.mxu0 %vm1328_vm0, %v1327_v1  ;;  %v1167_v26 = vld [vmem:[#allocation5 + $0x30] sm:$0xff]   ;;  %v204_v34 = vand.u32 127, %v203_v0  ;;  %vm400_vm12 = vcmask 1044484  }
  0x58   : > { %1022 = vmatprep.subr.bf16.mxu0 %v1327_v1  ;;  %1056 = vmatprep.mubr.msk.bf16.mxu1 %vm1328_vm0, %v1327_v1  ;;  %v1168_v27 = vld [vmem:[#allocation5 + $0x38] sm:$0xff]   ;;  %v1169_v28 = vld [vmem:[#allocation5 + $0x40] sm:$0xff]   ;;  %v1170_v29 = vld [vmem:[#allocation5 + $0x48] sm:$0xff]   ;;  %vm402_vm13 = vcmask 1045509   ;;  %vm404_vm14 = vcmask 1046534   ;;  %vm406_vm15 = vcmask 1047559  }
  0x59   : > { %v221_v3 = vsub.s32 2, %v206_v2  ;;  %v207_v4 = vsub.s32 0, %v206_v2  ;;  %v228_v5 = vsub.s32 3, %v206_v2  ;;  %v214_v6 = vsub.s32 1, %v206_v2  ;;  %1041 = vmatpush3.bf16.msra.mxu1 %v1169_v28  ;;  %v1171_v30 = vld [vmem:[#allocation5 + $0x50] sm:$0xff]   ;;  %v1172_v31 = vld [vmem:[#allocation5 + $0x58] sm:$0xff]  }
  0x5a   : > { %v242_v11 = vsub.s32 5, %v206_v2  ;;  %v235_v12 = vsub.s32 4, %v206_v2  ;;  %v256_v15 = vsub.s32 7, %v206_v2  ;;  %v249_v19 = vsub.s32 6, %v206_v2  ;;  %1042 = vmatprep.subr.bf16.mxu1 %v1327_v1  ;;  %v1173_v32 = vld [vmem:[#allocation5 + $0x60] sm:$0xff]   ;;  %v1174_v33 = vld [vmem:[#allocation5 + $0x68] sm:$0xff]  }
  0x5b   : > { %v222_v8 = vrot.slane %v202_v7, %v221_v3  ;;  %v208_v9 = vrot.slane %v202_v7, %v207_v4  ;;  %v229_v13 = vrot.slane %v202_v7, %v228_v5  ;;  %v215_v14 = vrot.slane %v202_v7, %v214_v6  ;;  %1023 = vmatpush3.bf16.msra.mxu0 %v1162_v16  ;;  %s981_s10 = sshll.u32 %s1371_s16, 7  ;;  %s200_s11 = scalar_lea.vmem [#allocation7], %s933_s22 }
  0x5c   : > { %v243_v17 = vrot.slane %v202_v7, %v242_v11  ;;  %v236_v18 = vrot.slane %v202_v7, %v235_v12  ;;  %1024 = vmatprep.subr.bf16.mxu0 %v1327_v1  ;;  %v257_v21 = vrot.slane %v202_v7, %v256_v15  ;;  %v250_v22 = vrot.slane %v202_v7, %v249_v19  ;;  %s846_s27 = sshll.u32 %s200_s11, 4  ;;  %s1560_s23 = scalar_lea.hbm %s1606_s3, %s981_s10  ;;  %s1562_s27 = int_to_ptr.vmem [resolvable:$true] %s846_s27 }
  0x5d   : > { %224 = vbcast.lane.b32.xlu1 %v222_v8, 256  ;;  %210 = vbcast.lane.b32.xlu0 %v208_v9, 256  ;;  %s833_s16 = scalar_lea.sflag [#allocation4], %s1478_s30  ;;  %s1251_s6 = scalar_lea.vmem %s1562_s27, 128 }
  0x5e   : > { %1043 = vmatpush3.bf16.msra.mxu1 %v1170_v29  ;;  %p1252_p1 = scmp.ne.s32.totalorder %s1562_s27, %s1251_s6  ;;  %s1329_s22 = smov [#allocation7]  }
  0x5f   : > { %1025 = vmatpush3.bf16.msra.mxu0 %v1163_v20  ;;  %1044 = vmatprep.subr.bf16.mxu1 %v1327_v1  ;;  %s1255_s7 = sshll.u32 %s1329_s22, 4  ;;  %s1256_s7 = int_to_ptr.vmem [resolvable:$false] %s1255_s7 }
  0x60   : > { %1026 = vmatprep.subr.bf16.mxu0 %v1327_v1  ;;  %p1253_p4 = pnand %p1252_p1, %p1433_p12  ;;  %s1257_s18 = scalar_lea.vmem %s1256_s7, 256 }
  0x61   : > { %231 = vbcast.lane.b32.xlu1 %v229_v13, 256  ;;  %217 = vbcast.lane.b32.xlu0 %v215_v14, 256  ;;  %p1258_p8 = scmp.lt.s32.totalorder %s1562_s27, %s1256_s7  ;;  %p1259_p13 = scmp.lt.s32.totalorder %s1257_s18, %s1251_s6 }
  0x62   : > { %1045 = vmatpush3.bf16.msra.mxu1 %v1171_v30  ;;  %p1254_p6 = pneg %p1253_p4 }
  0x63   : > { %1027 = vmatpush3.bf16.msra.mxu0 %v1164_v23  ;;  %1046 = vmatprep.subr.bf16.mxu1 %v1327_v1  ;;  %p1260_p3 = por %p1259_p13, %p1258_p8 }
  0x64   : > { %1028 = vmatprep.subr.bf16.mxu0 %v1327_v1 }
  0x65   : > { %245 = vbcast.lane.b32.xlu1 %v243_v17, 256  ;;  %238 = vbcast.lane.b32.xlu0 %v236_v18, 256  ;;  %p1261_p7 = pnand %p1260_p3, %p1254_p6 }
  0x66   : > { %1047 = vmatpush3.bf16.msra.mxu1 %v1172_v31 }
  0x67   : > { %1029 = vmatpush3.bf16.msra.mxu0 %v1165_v24  ;;  %1048 = vmatprep.subr.bf16.mxu1 %v1327_v1 }
  0x68   : > { %1030 = vmatprep.subr.bf16.mxu0 %v1327_v1 }
  0x69   : > { %259 = vbcast.lane.b32.xlu1 %v257_v21, 256  ;;  %252 = vbcast.lane.b32.xlu0 %v250_v22, 256 }
  0x6a   : > { %1049 = vmatpush3.bf16.msra.mxu1 %v1173_v32 }
  0x6b   : > { %1031 = vmatpush3.bf16.msra.mxu0 %v1166_v25  ;;  %1050 = vmatprep.subr.bf16.mxu1 %v1327_v1 }
  0x6c   : > { %1032 = vmatprep.subr.bf16.mxu0 %v1327_v1 }
  0x6e   : > { %1051 = vmatpush3.bf16.msra.mxu1 %v1174_v33 }
  0x6f   : > { %1033 = vmatpush3.bf16.msra.mxu0 %v1167_v26  ;;  %1052 = vmatprep.subr.bf16.mxu1 %v1327_v1 }
  0x70   : > { %1034 = vmatprep.subr.bf16.mxu0 %v1327_v1 }
  0x73   : > { %1035 = vmatpush3.bf16.msra.mxu0 %v1168_v27 }
  0x74   : > { %1060 = vmatprep.subr.bf16.mxu0 %v1327_v1 }
  0xcf   : > { %v225_v35 = vpop.permute.xlu1 %224  ;;  %v211_v36 = vpop.permute.xlu0 %210 }
  0xd0   : > { %vm263_vm1 = vcmp.eq.s32.totalorder %v225_v35, %v204_v34  ;;  %vm261_vm2 = vcmp.eq.s32.totalorder %v211_v36, %v204_v34 }
  0xd1   : > { %v938_v37 = vsel %vm263_vm1, 1.0, %v1327_v1  ;;  %v936_v38 = vsel %vm261_vm2, 1.0, %v1327_v1 }
  0xd2   : > { %v313_v39 = vrot.slane %v938_v37, 4  ;;  %v301_v40 = vrot.slane %v936_v38, 4 }
  0xd3   : > { %v232_v41 = vpop.permute.xlu1 %231  ;;  %v218_v42 = vpop.permute.xlu0 %217 }
  0xd4   : > { %v314_v43 = vadd.f32 %v938_v37, %v313_v39  ;;  %v302_v44 = vadd.f32 %v936_v38, %v301_v40  ;;  %vm264_vm3 = vcmp.eq.s32.totalorder %v232_v41, %v204_v34  ;;  %vm262_vm4 = vcmp.eq.s32.totalorder %v218_v42, %v204_v34 }
  0xd5   : > { %v939_v45 = vsel %vm264_vm3, 1.0, %v1327_v1  ;;  %v937_v46 = vsel %vm262_vm4, 1.0, %v1327_v1 }
  0xd6   : > { %v315_v47 = vrot.slane %v314_v43, 2  ;;  %v303_v48 = vrot.slane %v302_v44, 2  ;;  %v319_v49 = vrot.slane %v939_v45, 4  ;;  %v307_v50 = vrot.slane %v937_v46, 4 }
  0xd7   : > { %v246_v51 = vpop.permute.xlu1 %245  ;;  %v239_v52 = vpop.permute.xlu0 %238 }
  0xd8   : > { %v316_v53 = vadd.f32 %v315_v47, %v314_v43  ;;  %v304_v54 = vadd.f32 %v303_v48, %v302_v44  ;;  %v320_v55 = vadd.f32 %v939_v45, %v319_v49  ;;  %v308_v56 = vadd.f32 %v937_v46, %v307_v50 }
  0xd9   : > { %vm266_vm5 = vcmp.eq.s32.totalorder %v246_v51, %v204_v34  ;;  %vm265_vm6 = vcmp.eq.s32.totalorder %v239_v52, %v204_v34 }
  0xda   : > { %v317_v57 = vrot.slane %v316_v53, 1  ;;  %v305_v58 = vrot.slane %v304_v54, 1  ;;  %v321_v59 = vrot.slane %v320_v55, 2  ;;  %v309_v60 = vrot.slane %v308_v56, 2 }
  0xdb   : > { %v941_v61 = vsel %vm266_vm5, 1.0, %v1327_v1  ;;  %v940_v62 = vsel %vm265_vm6, 1.0, %v1327_v1  ;;  %v260_v63 = vpop.permute.xlu1 %259  ;;  %v253_v0 = vpop.permute.xlu0 %252 }
  0xdc   : > { %v306_v2 = vadd.f32 %v305_v58, %v304_v54  ;;  %v322_v3 = vadd.f32 %v321_v59, %v320_v55  ;;  %v310_v4 = vadd.f32 %v309_v60, %v308_v56  ;;  %v331_v5 = vrot.slane %v941_v61, 4  ;;  %v1175_v60 = vld [vmem:[#allocation5 + $0x70] sm:$0xff]  }
  0xdd   : > { %v325_v6 = vrot.slane %v940_v62, 4  ;;  %vm268_vm7 = vcmp.eq.s32.totalorder %v260_v63, %v204_v34  ;;  %vm267_vm8 = vcmp.eq.s32.totalorder %v253_v0, %v204_v34  ;;  %v318_v7 = vadd.f32 %v317_v57, %v316_v53  ;;  %1053 = vmatpush3.bf16.msra.mxu1 %v1175_v60  ;;  %v1178_v63 = vld [vmem:[#allocation5 + $0x88] sm:$0xff]   ;;  %v1179_v0 = vld [vmem:[#allocation5 + $0x90] sm:$0xff]  }
  0xde   : > { %v323_v8 = vrot.slane %v322_v3, 1  ;;  %v311_v9 = vrot.slane %v310_v4, 1  ;;  %v332_v10 = vadd.f32 %v941_v61, %v331_v5  ;;  %v943_v12 = vsel %vm268_vm7, 1.0, %v1327_v1  ;;  %1054 = vmatprep.subr.bf16.mxu1 %v1327_v1  ;;  %v1176_v61 = vld [vmem:[#allocation5 + $0x78] sm:$0xff]   ;;  %v944_v5 = vld [vmem:[%s1605_s2] ss:$0 sm:$0xff] }
  0xdf   : > { %v326_v11 = vadd.f32 %v940_v62, %v325_v6  ;;  %v942_v13 = vsel %vm267_vm8, 1.0, %v1327_v1  ;;  %v349_v14 = vpack.c.bf16 %v306_v2, %v306_v2  ;;  %v343_v19 = vrot.slane %v943_v12, 4  ;;  %v1177_v62 = vld [vmem:[#allocation5 + $0x80] sm:$0xff]   ;;  %v1180_v2 = vld [vmem:[#allocation5 + $0x98] sm:$0xff]  }
  0xe0   : > { %v324_v15 = vadd.f32 %v323_v8, %v322_v3  ;;  %v312_v16 = vadd.f32 %v311_v9, %v310_v4  ;;  %v333_v17 = vrot.slane %v332_v10, 2  ;;  %v337_v20 = vrot.slane %v942_v13, 4  ;;  %v1181_v3 = vld [vmem:[#allocation5 + $0xa0] sm:$0xff]   ;;  %v1182_v4 = vld [vmem:[#allocation5 + $0xa8] sm:$0xff]  }
  0xe1   : > { %v327_v18 = vrot.slane %v326_v11, 2  ;;  %v351_v21 = vpack.c.bf16 %v318_v7, %v318_v7  ;;  %v344_v25 = vadd.f32 %v943_v12, %v343_v19  ;;  %v386_v27 = vunpack.c.l.b16 %v349_v14  ;;  %1055 = vmatpush3.bf16.msra.mxu1 %v1176_v61  ;;  %v1184_v14 = vld [vmem:[#allocation5 + $0xb8] sm:$0xff]   ;;  %v1189_v19 = vld [vmem:[#allocation5 + $0xe0] sm:$0xff]  }
  0xe2   : > { %v350_v22 = vpack.c.bf16 %v312_v16, %v312_v16  ;;  %v334_v23 = vadd.f32 %v333_v17, %v332_v10  ;;  %v338_v26 = vadd.f32 %v942_v13, %v337_v20  ;;  %v352_v28 = vpack.c.bf16 %v324_v15, %v324_v15  ;;  %1080 = vmatprep.subr.bf16.mxu1 %v1327_v1  ;;  %v1183_v13 = vld [vmem:[#allocation5 + $0xb0] sm:$0xff]   ;;  %v1185_v15 = vld [vmem:[#allocation5 + $0xc0] sm:$0xff]   ;;  %v1186_v16 = vld [vmem:[#allocation5 + $0xc8] sm:$0xff]  }
  0xe3   : > { %v328_v24 = vadd.f32 %v327_v18, %v326_v11  ;;  %v345_v32 = vrot.slane %v344_v25, 2  ;;  %v388_v34 = vunpack.c.l.b16 %v351_v21  ;;  %v1187_v17 = vld [vmem:[#allocation5 + $0xd0] sm:$0xff]   ;;  %v1188_v18 = vld [vmem:[#allocation5 + $0xd8] sm:$0xff]   ;;  %v1190_v20 = vld [vmem:[#allocation5 + $0xe8] sm:$0xff]  }
  0xe4   : > { %v387_v29 = vunpack.c.l.b16 %v350_v22  ;;  %v335_v30 = vrot.slane %v334_v23, 1  ;;  %v339_v33 = vrot.slane %v338_v26, 2  ;;  %v389_v41 = vunpack.c.l.b16 %v352_v28  ;;  %v953_v21 = vld [vmem:[%s1605_s2 + $0x1] ss:$0 sm:$0xff] }
  0xe5   : > { %v329_v31 = vrot.slane %v328_v24, 1  ;;  %v346_v38 = vadd.f32 %v345_v32, %v344_v25 }
  0xe6   : > { %v395_v35 = vsel %vm394_vm9, %v387_v29, %v386_v27  ;;  %v336_v36 = vadd.f32 %v335_v30, %v334_v23  ;;  %v340_v40 = vadd.f32 %v339_v33, %v338_v26  ;;  %v1191_v29 = vld [vmem:[#allocation5 + $0xf0] sm:$0xff]   ;;  %v1192_v30 = vld [vmem:[#allocation5 + $0xf8] sm:$0xff]  }
  0xe7   : > { %v330_v37 = vadd.f32 %v329_v31, %v328_v24  ;;  %v397_v39 = vsel %vm396_vm10, %v388_v34, %v395_v35  ;;  %v347_v44 = vrot.slane %v346_v38, 1  ;;  %v962_v31 = vld [vmem:[%s1605_s2 + $0x2] ss:$0 sm:$0xff] }
  0xe8   : > { %v354_v42 = vpack.c.bf16 %v336_v36, %v336_v36  ;;  %v341_v45 = vrot.slane %v340_v40, 1  ;;  %v399_v48 = vsel %vm398_vm11, %v389_v41, %v397_v39 }
  0xe9   : > { %v353_v43 = vpack.c.bf16 %v330_v37, %v330_v37  ;;  %v348_v47 = vadd.f32 %v347_v44, %v346_v38 }
  0xea   : > { %v342_v49 = vadd.f32 %v341_v45, %v340_v40  ;;  %v391_v50 = vunpack.c.l.b16 %v354_v42 }
  0xeb   : > { %v390_v46 = vunpack.c.l.b16 %v353_v43  ;;  %v356_v51 = vpack.c.bf16 %v348_v47, %v348_v47 }
  0xec   : > { %v355_v52 = vpack.c.bf16 %v342_v49, %v342_v49 }
  0xed   : > { %v401_v53 = vsel %vm400_vm12, %v390_v46, %v399_v48  ;;  %v393_v54 = vunpack.c.l.b16 %v356_v51 }
  0xee   : > { %v392_v55 = vunpack.c.l.b16 %v355_v52  ;;  %v403_v56 = vsel %vm402_vm13, %v391_v50, %v401_v53 }
  0xf0   : > { %v405_v57 = vsel %vm404_vm14, %v392_v55, %v403_v56 }
  0xf1   : > { %v407_v58 = vsel %vm406_vm15, %v393_v54, %v405_v57 }
  0xf2   : > { %v408_v59 = vpack.c.b16 %v407_v58, %v407_v58 }
  0xf4   : > { %1037 = vmatmul.mubr.bf16.vlgmr.msra.gmra.mrb[0].mxu0 %v408_v59 }
  0xf5   : > { %1076 = vmatprep.mubr.msk.bf16.mxu0 %vm1328_vm0, %v1327_v1  ;;  %1061 = vmatpush3.bf16.msra.mxu0 %v1177_v62 }
  0xf6   : > { %1062 = vmatprep.subr.bf16.mxu0 %v1327_v1 }
  0xf9   : > { %1063 = vmatpush3.bf16.msra.mxu0 %v1178_v63 }
  0xfa   : > { %1064 = vmatprep.subr.bf16.mxu0 %v1327_v1 }
  0xfd   : > { %1065 = vmatpush3.bf16.msra.mxu0 %v1179_v0 }
  0xfe   : > { %1066 = vmatprep.subr.bf16.mxu0 %v1327_v1 }
 0x101   : > { %1067 = vmatpush3.bf16.msra.mxu0 %v1180_v2 }
 0x102   : > { %1068 = vmatprep.subr.bf16.mxu0 %v1327_v1 }
 0x105   : > { %1069 = vmatpush3.bf16.msra.mxu0 %v1181_v3 }
 0x106   : > { %1070 = vmatprep.subr.bf16.mxu0 %v1327_v1 }
 0x109   : > { %1071 = vmatpush3.bf16.msra.mxu0 %v1182_v4 }
 0x10a   : > { %1072 = vmatprep.subr.bf16.mxu0 %v1327_v1 }
 0x10d   : > { %1073 = vmatpush3.bf16.msra.mxu0 %v1183_v13 }
 0x10e   : > { %1074 = vmatprep.subr.bf16.mxu0 %v1327_v1 }
 0x111   : > { %1075 = vmatpush3.bf16.msra.mxu0 %v1184_v14 }
 0x1c7   : > { %v492_v6 = vpop.f32.mrb[0].mxu0 }
 0x1c8   : > { %v493_v7 = vadd.f32 %v944_v5, %v492_v6  ;;  %v1038_v8 = vpop.f32.mrb[1].mxu0 }
 0x1c9   : > { %v495_v9 = vpop.f32.mrb[2].mxu0 }
 0x1ca   : > { %v498_v10 = vmax.f32 %v493_v7, 0.0  ;;  %v1039_v11 = vpop.f32.mrb[3].mxu0 }
 0x1cc   : > { %v499_v12 = vpack.c.bf16 %v498_v10, %v498_v10 }
 0x1ce   : > { %1057 = vmatmul.mubr.bf16.vlgmr.msra.gmra.mrb[0].mxu1 %v499_v12 }
 0x1cf   : > { %1096 = vmatprep.mubr.msk.bf16.mxu1 %vm1328_vm0, %v1327_v1  ;;  %1081 = vmatpush3.bf16.msra.mxu1 %v1185_v15 }
 0x1d0   : > { %1082 = vmatprep.subr.bf16.mxu1 %v1327_v1 }
 0x1d3   : > { %1083 = vmatpush3.bf16.msra.mxu1 %v1186_v16 }
 0x1d4   : > { %1084 = vmatprep.subr.bf16.mxu1 %v1327_v1 }
 0x1d7   : > { %1085 = vmatpush3.bf16.msra.mxu1 %v1187_v17 }
 0x1d8   : > { %1086 = vmatprep.subr.bf16.mxu1 %v1327_v1 }
 0x1db   : > { %1087 = vmatpush3.bf16.msra.mxu1 %v1188_v18 }
 0x1dc   : > { %1088 = vmatprep.subr.bf16.mxu1 %v1327_v1 }
 0x1df   : > { %1089 = vmatpush3.bf16.msra.mxu1 %v1189_v19 }
 0x1e0   : > { %1090 = vmatprep.subr.bf16.mxu1 %v1327_v1 }
 0x1e3   : > { %1091 = vmatpush3.bf16.msra.mxu1 %v1190_v20 }
 0x1e4   : > { %1092 = vmatprep.subr.bf16.mxu1 %v1327_v1 }
 0x1e7   : > { %1093 = vmatpush3.bf16.msra.mxu1 %v1191_v29 }
 0x1e8   : > { %1094 = vmatprep.subr.bf16.mxu1 %v1327_v1  ;;  %v971_v1 = vld [vmem:[%s1605_s2 + $0x3] ss:$0 sm:$0xff] }
 0x1eb   : > { %1095 = vmatpush3.bf16.msra.mxu1 %v1192_v30 }
 0x2a1   : > { %v603_v22 = vpop.f32.mrb[0].mxu1 }
 0x2a2   : > { %v604_v23 = vadd.f32 %v953_v21, %v603_v22  ;;  %v1058_v24 = vpop.f32.mrb[1].mxu1 }
 0x2a3   : > { %v606_v25 = vpop.f32.mrb[2].mxu1 }
 0x2a4   : > { %v609_v26 = vmax.f32 %v604_v23, 0.0  ;;  %v1059_v27 = vpop.f32.mrb[3].mxu1 }
 0x2a6   : > { %v610_v28 = vpack.c.bf16 %v609_v26, %v609_v26 }
 0x2a8   : > { %1077 = vmatmul.mubr.bf16.vlgmr.msra.gmra.mrb[4].mxu0 %v610_v28 }
 0x37b   : > { %v714_v32 = vpop.f32.mrb[4].mxu0 }
 0x37c   : > { %v715_v33 = vadd.f32 %v962_v31, %v714_v32  ;;  %v1078_v34 = vpop.f32.mrb[5].mxu0 }
 0x37d   : > { %v717_v35 = vpop.f32.mrb[6].mxu0 }
 0x37e   : > { %v720_v36 = vmax.f32 %v715_v33, 0.0  ;;  %v1079_v37 = vpop.f32.mrb[7].mxu0 }
 0x380   : > { %v721_v38 = vpack.c.bf16 %v720_v36, %v720_v36 }
 0x382   : > { %1097 = vmatmul.mubr.bf16.vlgmr.msra.gmra.mrb[4].mxu1 %v721_v38 }
 0x455   : > { %v825_v39 = vpop.f32.mrb[4].mxu1 }
 0x456   : > { %v826_v40 = vadd.f32 %v971_v1, %v825_v39  ;;  %v1098_v41 = vpop.f32.mrb[5].mxu1 }
 0x457   : > { %v828_v42 = vpop.f32.mrb[6].mxu1 }
 0x458   : > { %831 = vst [vmem:[%s200_s11] sm:$0xff] %v826_v40  ;;  %v1099_v43 = vpop.f32.mrb[7].mxu1 }
 0x459   : > { %1264 = shalt.err (!%p1261_p7)
}
 0x45a   : > { %s1265_s30 = scalar_lea.hbm %s1560_s23, 128  ;;  %s1269_s25 = scalar_lea.hbm %s1606_s3, 512 }
 0x45b   : > { %p1266_p9 = scmp.ne.s32.totalorder %s1560_s23, %s1265_s30  ;;  %p1270_p0 = scmp.lt.u32.totalorder %s1560_s23, %s1606_s3 }
 0x45c   : > { %p1271_p10 = scmp.lt.u32.totalorder %s1269_s25, %s1265_s30  ;;  %p1273_p1 = scmp.lt.u32.totalorder %s1265_s30, %s1560_s23 }
 0x45d   : > { %p1267_p11 = pnand %p1266_p9, %p1433_p12 }
 0x45e   : > { %p1272_p2 = por %p1271_p10, %p1270_p0 }
 0x45f   : > { %p1268_p5 = pneg %p1267_p11 }
 0x460   : > { %p1274_p4 = por %p1273_p1, %p1272_p2 }
 0x462   : > { %p1275_p6 = pnand %p1274_p4, %p1268_p5 }
 0x464   : > { %1278 = shalt.err (!%p1275_p6)
}
 0x465   : > { %1106 = dma.vmem_to_hbm [thread:$0]  (%p1433_p12), %s1562_s27, 128, %s1560_s23, %s833_s16  }
 0x466 PF: > { %p1123_p8 = scmp.ge.s32.totalorder %s1321_s15, 2  ;;  %s858_s8 = sand.u32 1, %s1309_s12  }
 0x467   : > { %p1621_p13 = scmp.ne.s32.totalorder %s1611_s19, 0  ;;  %s859_s9 = scalar_lea.sflag [#allocation4], %s858_s8 }
 0x469   : > { %p1117_p3 = pnand %p1123_p8, %p1621_p13 }
 0x46b   : > { %1304 = dma.done.wait (!%p1117_p3), %s859_s9, 128  }
 0x46c   : > { %1306 = vsyncadd (!%p1117_p3), %s859_s9, 4294967168  ;;  %p17_p7 = scmp.ge.s32.totalorder %s1403_s24, 6   ;;  %s1622_s12 = smov %s1313_s13 }
 0x46d   : > { %s1623_s13 = smov %s1317_s14  ;;  %s1624_s14 = smov %s1429_s17 }
 0x46e   : > { %s1625_s15 = smov %s1403_s24  ;;  %19 = sbr.rel (!%p17_p7) target bundleno = 6 (0x6), region = 81 }
 0x475   :  { %864 = vsyncpa [#allocation3], 1 }
 0x476   :  { %866 = vsyncpa [#allocation3 + $0x1], 1 }
 0x477   :  { %867 = vsyncpa [#allocation6], 1 }
 0x478   :  { %868 = vsyncpa [#allocation4], 1 }
 0x479   :  { %870 = vsyncpa [#allocation4 + $0x1], 1 }

</bundles_post_ra>
